<compile_context>
chip_gen: v5e
topology: v5e:2x2
jax: 0.10.0
libtpu: 0.0.40
codegen_flags: <defaults>
</compile_context>

<pallas_src>
import functools
import numpy as np
import jax
import jax.numpy as jnp
from jax import lax
from jax.experimental import pallas as pl
from jax.experimental.pallas import tpu as pltpu

# ------------------------------- config (small) ------------------------------
EMB_SIZE = 32      # d_model
N_HEAD   = 4
D_K      = 8
D_V      = 8
D_HIDDEN = 64
LN_EPS   = 1e-6

B     = 2
L_DEC = 8          # query length
L_ENC = 12         # key/value length


# -------------------------------- fused kernel -------------------------------
def decoder_layer_kernel(x_ref, kv_ref, mask_ref,
                         wq_ref, bq_ref, wk_ref, bk_ref, wv_ref, bv_ref,
                         wo_ref, bo_ref, g1_ref, beta1_ref,
                         w1_ref, fb1_ref, w2_ref, fb2_ref, g2_ref, beta2_ref,
                         out_ref, *, n_head, d_k, d_v, eps):
    """Enc-dec MHA + residual + LN, then FFN + residual + LN, one batch element."""
    x = x_ref[0]             # (Lq, D)
    kv = kv_ref[0]           # (Lk, D)
    mask_add = mask_ref[0]   # (Lq, Lk) additive mask: 0 or -1e9 (hoisted out of head loop)

    q = jnp.dot(x,  wq_ref[...], preferred_element_type=jnp.float32) + bq_ref[...]
    k = jnp.dot(kv, wk_ref[...], preferred_element_type=jnp.float32) + bk_ref[...]
    v = jnp.dot(kv, wv_ref[...], preferred_element_type=jnp.float32) + bv_ref[...]
    wo = wo_ref[...]         # (n_head*d_v, D)

    scale = 1.0 / float(np.sqrt(d_k))
    attn_out = jnp.zeros_like(x)            # (Lq, D) accumulator; no concatenate needed
    for h in range(n_head):                 # static unroll (n_head = 4)
        qh = q[:, h * d_k:(h + 1) * d_k]
        kh = k[:, h * d_k:(h + 1) * d_k]
        vh = v[:, h * d_v:(h + 1) * d_v]
        # contract on the last axis -> no explicit kh.T (no XLU transpose)
        s = lax.dot_general(qh, kh, (((1,), (1,)), ((), ())),
                            preferred_element_type=jnp.float32) * scale + mask_add
        m = jnp.max(s, axis=-1, keepdims=True)
        e = jnp.exp(s - m)
        p = e * pl.reciprocal(jnp.sum(e, axis=-1, keepdims=True), approx=True)
        ctx = jnp.dot(p, vh, preferred_element_type=jnp.float32)          # (Lq, d_v)
        attn_out = attn_out + jnp.dot(ctx, wo[h * d_v:(h + 1) * d_v, :],
                                      preferred_element_type=jnp.float32)

    # output projection bias + residual + LayerNorm   (dropout = identity, eval mode)
    y = attn_out + bo_ref[...] + x
    mu = jnp.mean(y, axis=-1, keepdims=True)
    var = jnp.mean((y - mu) ** 2, axis=-1, keepdims=True)
    y = (y - mu) * lax.rsqrt(var + eps) * g1_ref[...] + beta1_ref[...]

    # position-wise FFN + residual + LayerNorm
    hdn = jnp.maximum(
        jnp.dot(y, w1_ref[...], preferred_element_type=jnp.float32) + fb1_ref[...], 0.0)
    z = jnp.dot(hdn, w2_ref[...], preferred_element_type=jnp.float32) + fb2_ref[...] + y
    mu2 = jnp.mean(z, axis=-1, keepdims=True)
    var2 = jnp.mean((z - mu2) ** 2, axis=-1, keepdims=True)
    out_ref[0] = (z - mu2) * lax.rsqrt(var2 + eps) * g2_ref[...] + beta2_ref[...]


# --------------------------------- wrapper ------------------------------------
def decoder_layer_forward(dec_input, self_attn_mask, enc_out, enc_dec_mask, params):
    # The reference's self-attention result is discarded -> self_attn_mask is dead.
    del self_attn_mask
    Bb, Lq, D = dec_input.shape
    _, Lk, _ = enc_out.shape

    # precompute the additive mask once (0 / -1e9), hoisted out of the kernel's head loop
    mask_add = jnp.where(enc_dec_mask > 0, jnp.float32(-1e9), jnp.float32(0.0))

    weights = (params["wq"], params["bq"], params["wk"], params["bk"],
               params["wv"], params["bv"], params["wo"], params["bo"],
               params["ln1_g"], params["ln1_b"],
               params["w1"], params["fb1"], params["w2"], params["fb2"],
               params["ln2_g"], params["ln2_b"])

    kernel = functools.partial(decoder_layer_kernel,
                               n_head=N_HEAD, d_k=D_K, d_v=D_V, eps=LN_EPS)

    flops = 2 * Bb * (Lq * D * N_HEAD * D_K + 2 * Lk * D * N_HEAD * D_K
                      + N_HEAD * (Lq * Lk * D_K + Lq * Lk * D_V + Lq * D_V * D)
                      + 2 * Lq * D * D_HIDDEN)
    bytes_accessed = 4 * (dec_input.size + enc_out.size + mask_add.size
                          + sum(int(w.size) for w in weights) + Bb * Lq * D)
    cost = pl.CostEstimate(flops=int(flops),
                           transcendentals=int(Bb * N_HEAD * Lq * Lk),
                           bytes_accessed=int(bytes_accessed))

    return pl.pallas_call(
        kernel,
        out_shape=jax.ShapeDtypeStruct((Bb, Lq, D), jnp.float32),
        grid=(Bb,),
        in_specs=[
            pl.BlockSpec((1, Lq, D), lambda b: (b, 0, 0)),     # dec_input block
            pl.BlockSpec((1, Lk, D), lambda b: (b, 0, 0)),     # enc_out block
            pl.BlockSpec((1, Lq, Lk), lambda b: (b, 0, 0)),    # additive mask block
        ] + [pl.BlockSpec(w.shape, lambda b: (0, 0)) for w in weights],
        out_specs=pl.BlockSpec((1, Lq, D), lambda b: (b, 0, 0)),
        compiler_params=pltpu.CompilerParams(dimension_semantics=("parallel",)),
        cost_estimate=cost,
    )(dec_input, enc_out, mask_add, *weights)


# --------------------------- pure-JAX reference -------------------------------
def _layer_norm(y, g, b):
    mu = y.mean(-1, keepdims=True)
    var = ((y - mu) ** 2).mean(-1, keepdims=True)
    return (y - mu) / jnp.sqrt(var + LN_EPS) * g + b


def decoder_layer_ref(dec_input, self_attn_mask, enc_out, enc_dec_mask, p):
    del self_attn_mask    # dead in the reference module as well
    x, kv = dec_input, enc_out
    q = x @ p["wq"] + p["bq"]
    k = kv @ p["wk"] + p["bk"]
    v = kv @ p["wv"] + p["bv"]
    outs = []
    for h in range(N_HEAD):
        qh = q[..., h * D_K:(h + 1) * D_K]
        kh = k[..., h * D_K:(h + 1) * D_K]
        vh = v[..., h * D_V:(h + 1) * D_V]
        s = jnp.einsum("bqd,bkd->bqk", qh, kh) / np.sqrt(D_K)
        s = jnp.where(enc_dec_mask > 0, -1e9, s)
        a = jax.nn.softmax(s, axis=-1)
        outs.append(jnp.einsum("bqk,bkd->bqd", a, vh))
    y = jnp.concatenate(outs, -1) @ p["wo"] + p["bo"] + x
    y = _layer_norm(y, p["ln1_g"], p["ln1_b"])
    hdn = jnp.maximum(y @ p["w1"] + p["fb1"], 0.0)
    z = hdn @ p["w2"] + p["fb2"] + y
    return _layer_norm(z, p["ln2_g"], p["ln2_b"])


# -------------------------------- param init ----------------------------------
def init_params(key):
    ks = jax.random.split(key, 11)

    def w(k, shape, s=0.05):
        return s * jax.random.normal(k, shape, jnp.float32)

    return {
        "wq": w(ks[0], (EMB_SIZE, N_HEAD * D_K)),
        "bq": 0.01 * jax.random.normal(ks[1], (1, N_HEAD * D_K), jnp.float32),
        "wk": w(ks[2], (EMB_SIZE, N_HEAD * D_K)),
        "bk": 0.01 * jax.random.normal(ks[3], (1, N_HEAD * D_K), jnp.float32),
        "wv": w(ks[4], (EMB_SIZE, N_HEAD * D_V)),
        "bv": jnp.zeros((1, N_HEAD * D_V), jnp.float32),
        "wo": w(ks[5], (N_HEAD * D_V, EMB_SIZE)),
        "bo": 0.01 * jax.random.normal(ks[6], (1, EMB_SIZE), jnp.float32),
        "ln1_g": jnp.ones((1, EMB_SIZE), jnp.float32),
        "ln1_b": jnp.zeros((1, EMB_SIZE), jnp.float32),
        "w1": w(ks[7], (EMB_SIZE, D_HIDDEN)),
        "fb1": 0.01 * jax.random.normal(ks[8], (1, D_HIDDEN), jnp.float32),
        "w2": w(ks[9], (D_HIDDEN, EMB_SIZE)),
        "fb2": 0.01 * jax.random.normal(ks[10], (1, EMB_SIZE), jnp.float32),
        "ln2_g": jnp.ones((1, EMB_SIZE), jnp.float32),
        "ln2_b": jnp.zeros((1, EMB_SIZE), jnp.float32),
    }


# ------------------------------------ main -------------------------------------
if __name__ == "__main__":
    key = jax.random.PRNGKey(0)
    kp, kx, ke = jax.random.split(key, 3)

    params = init_params(kp)

    dec_input = jax.random.normal(kx, (B, L_DEC, EMB_SIZE), jnp.float32)
    enc_out   = jax.random.normal(ke, (B, L_ENC, EMB_SIZE), jnp.float32)

    # masks: >0 means "masked out" (matches masked_fill semantics of the reference)
    self_attn_mask = jnp.broadcast_to(
        jnp.triu(jnp.ones((L_DEC, L_DEC), jnp.float32), k=1)[None], (B, L_DEC, L_DEC))
    key_pad = jnp.zeros((B, L_ENC), jnp.float32).at[:, -3:].set(1.0)   # padded enc keys
    enc_dec_mask = jnp.broadcast_to(key_pad[:, None, :], (B, L_DEC, L_ENC))

    fwd = jax.jit(decoder_layer_forward)
    out = fwd(dec_input, self_attn_mask, enc_out, enc_dec_mask, params)
    out = jax.block_until_ready(out)

    ref = decoder_layer_ref(dec_input, self_attn_mask, enc_out, enc_dec_mask, params)
    np.testing.assert_allclose(np.asarray(out), np.asarray(ref), rtol=1e-2, atol=1e-2)

    print("KERNEL_OK")
</pallas_src>

<mosaic_0001>
module attributes {stable_mosaic.version = 11 : i64} {
  func.func @decoder_layer_kernel(%arg0: i32, %arg1: memref<1x8x32xf32, #tpu.memory_space<vmem>>, %arg2: memref<1x12x32xf32, #tpu.memory_space<vmem>>, %arg3: memref<1x8x12xf32, #tpu.memory_space<vmem>>, %arg4: memref<32x32xf32, #tpu.memory_space<vmem>>, %arg5: memref<1x32xf32, #tpu.memory_space<vmem>>, %arg6: memref<32x32xf32, #tpu.memory_space<vmem>>, %arg7: memref<1x32xf32, #tpu.memory_space<vmem>>, %arg8: memref<32x32xf32, #tpu.memory_space<vmem>>, %arg9: memref<1x32xf32, #tpu.memory_space<vmem>>, %arg10: memref<32x32xf32, #tpu.memory_space<vmem>>, %arg11: memref<1x32xf32, #tpu.memory_space<vmem>>, %arg12: memref<1x32xf32, #tpu.memory_space<vmem>>, %arg13: memref<1x32xf32, #tpu.memory_space<vmem>>, %arg14: memref<32x64xf32, #tpu.memory_space<vmem>>, %arg15: memref<1x64xf32, #tpu.memory_space<vmem>>, %arg16: memref<64x32xf32, #tpu.memory_space<vmem>>, %arg17: memref<1x32xf32, #tpu.memory_space<vmem>>, %arg18: memref<1x32xf32, #tpu.memory_space<vmem>>, %arg19: memref<1x32xf32, #tpu.memory_space<vmem>>, %arg20: memref<1x8x32xf32, #tpu.memory_space<vmem>>) attributes {dimension_semantics = [#tpu.dimension_semantics<parallel>], iteration_bounds = array<i64: 2>, scalar_prefetch = 0 : i64, scratch_operands = 0 : i64, tpu.core_type = #tpu.core_type<tc>, window_params = [{transform_indices = @transform_0, window_bounds = array<i64: 1, 8, 32>}, {transform_indices = @transform_1, window_bounds = array<i64: 1, 12, 32>}, {transform_indices = @transform_2, window_bounds = array<i64: 1, 8, 12>}, {pipeline_mode = #tpu.pipeline_mode<synchronous>, transform_indices = @transform_3, window_bounds = array<i64: 32, 32>}, {pipeline_mode = #tpu.pipeline_mode<synchronous>, transform_indices = @transform_4, window_bounds = array<i64: 1, 32>}, {pipeline_mode = #tpu.pipeline_mode<synchronous>, transform_indices = @transform_5, window_bounds = array<i64: 32, 32>}, {pipeline_mode = #tpu.pipeline_mode<synchronous>, transform_indices = @transform_6, window_bounds = array<i64: 1, 32>}, {pipeline_mode = #tpu.pipeline_mode<synchronous>, transform_indices = @transform_7, window_bounds = array<i64: 32, 32>}, {pipeline_mode = #tpu.pipeline_mode<synchronous>, transform_indices = @transform_8, window_bounds = array<i64: 1, 32>}, {pipeline_mode = #tpu.pipeline_mode<synchronous>, transform_indices = @transform_9, window_bounds = array<i64: 32, 32>}, {pipeline_mode = #tpu.pipeline_mode<synchronous>, transform_indices = @transform_10, window_bounds = array<i64: 1, 32>}, {pipeline_mode = #tpu.pipeline_mode<synchronous>, transform_indices = @transform_11, window_bounds = array<i64: 1, 32>}, {pipeline_mode = #tpu.pipeline_mode<synchronous>, transform_indices = @transform_12, window_bounds = array<i64: 1, 32>}, {pipeline_mode = #tpu.pipeline_mode<synchronous>, transform_indices = @transform_13, window_bounds = array<i64: 32, 64>}, {pipeline_mode = #tpu.pipeline_mode<synchronous>, transform_indices = @transform_14, window_bounds = array<i64: 1, 64>}, {pipeline_mode = #tpu.pipeline_mode<synchronous>, transform_indices = @transform_15, window_bounds = array<i64: 64, 32>}, {pipeline_mode = #tpu.pipeline_mode<synchronous>, transform_indices = @transform_16, window_bounds = array<i64: 1, 32>}, {pipeline_mode = #tpu.pipeline_mode<synchronous>, transform_indices = @transform_17, window_bounds = array<i64: 1, 32>}, {pipeline_mode = #tpu.pipeline_mode<synchronous>, transform_indices = @transform_18, window_bounds = array<i64: 1, 32>}, {transform_indices = @transform_19, window_bounds = array<i64: 1, 8, 32>}]} {
    %c0 = arith.constant 0 : index
    %c0_0 = arith.constant 0 : index
    %c0_1 = arith.constant 0 : index
    %0 = vector.load %arg1[%c0, %c0_0, %c0_1] : memref<1x8x32xf32, #tpu.memory_space<vmem>>, vector<1x8x32xf32>
    %1 = vector.shape_cast %0 : vector<1x8x32xf32> to vector<8x32xf32>
    %c0_2 = arith.constant 0 : index
    %c0_3 = arith.constant 0 : index
    %c0_4 = arith.constant 0 : index
    %2 = vector.load %arg2[%c0_2, %c0_3, %c0_4] : memref<1x12x32xf32, #tpu.memory_space<vmem>>, vector<1x12x32xf32>
    %3 = vector.shape_cast %2 : vector<1x12x32xf32> to vector<12x32xf32>
    %c0_5 = arith.constant 0 : index
    %c0_6 = arith.constant 0 : index
    %c0_7 = arith.constant 0 : index
    %4 = vector.load %arg3[%c0_5, %c0_6, %c0_7] : memref<1x8x12xf32, #tpu.memory_space<vmem>>, vector<1x8x12xf32>
    %5 = vector.shape_cast %4 : vector<1x8x12xf32> to vector<8x12xf32>
    %c0_8 = arith.constant 0 : index
    %c0_9 = arith.constant 0 : index
    %6 = vector.load %arg4[%c0_8, %c0_9] : memref<32x32xf32, #tpu.memory_space<vmem>>, vector<32x32xf32>
    %cst = arith.constant dense<0.000000e+00> : vector<8x32xf32>
    %7 = tpu.matmul %1, %6, %cst {dimension_numbers = #tpu.dot_dimension_numbers<[1], [0], [0], [1], [0, 0, 1, 1], [], []>} : vector<8x32xf32>, vector<32x32xf32>, vector<8x32xf32> -> vector<8x32xf32>
    %c0_10 = arith.constant 0 : index
    %c0_11 = arith.constant 0 : index
    %8 = vector.load %arg5[%c0_10, %c0_11] : memref<1x32xf32, #tpu.memory_space<vmem>>, vector<1x32xf32>
    %9 = vector.broadcast %8 : vector<1x32xf32> to vector<8x32xf32>
    %10 = arith.addf %7, %9 : vector<8x32xf32>
    %c0_12 = arith.constant 0 : index
    %c0_13 = arith.constant 0 : index
    %11 = vector.load %arg6[%c0_12, %c0_13] : memref<32x32xf32, #tpu.memory_space<vmem>>, vector<32x32xf32>
    %cst_14 = arith.constant dense<0.000000e+00> : vector<12x32xf32>
    %12 = tpu.matmul %3, %11, %cst_14 {dimension_numbers = #tpu.dot_dimension_numbers<[1], [0], [0], [1], [0, 0, 1, 1], [], []>} : vector<12x32xf32>, vector<32x32xf32>, vector<12x32xf32> -> vector<12x32xf32>
    %c0_15 = arith.constant 0 : index
    %c0_16 = arith.constant 0 : index
    %13 = vector.load %arg7[%c0_15, %c0_16] : memref<1x32xf32, #tpu.memory_space<vmem>>, vector<1x32xf32>
    %14 = vector.broadcast %13 : vector<1x32xf32> to vector<12x32xf32>
    %15 = arith.addf %12, %14 : vector<12x32xf32>
    %c0_17 = arith.constant 0 : index
    %c0_18 = arith.constant 0 : index
    %16 = vector.load %arg8[%c0_17, %c0_18] : memref<32x32xf32, #tpu.memory_space<vmem>>, vector<32x32xf32>
    %cst_19 = arith.constant dense<0.000000e+00> : vector<12x32xf32>
    %17 = tpu.matmul %3, %16, %cst_19 {dimension_numbers = #tpu.dot_dimension_numbers<[1], [0], [0], [1], [0, 0, 1, 1], [], []>} : vector<12x32xf32>, vector<32x32xf32>, vector<12x32xf32> -> vector<12x32xf32>
    %c0_20 = arith.constant 0 : index
    %c0_21 = arith.constant 0 : index
    %18 = vector.load %arg9[%c0_20, %c0_21] : memref<1x32xf32, #tpu.memory_space<vmem>>, vector<1x32xf32>
    %19 = vector.broadcast %18 : vector<1x32xf32> to vector<12x32xf32>
    %20 = arith.addf %17, %19 : vector<12x32xf32>
    %c0_22 = arith.constant 0 : index
    %c0_23 = arith.constant 0 : index
    %21 = vector.load %arg10[%c0_22, %c0_23] : memref<32x32xf32, #tpu.memory_space<vmem>>, vector<32x32xf32>
    %cst_24 = arith.constant 0.000000e+00 : f32
    %22 = vector.broadcast %cst_24 : f32 to vector<8x32xf32>
    %23 = vector.extract_strided_slice %10 {offsets = [0, 0], sizes = [8, 8], strides = [1, 1]} : vector<8x32xf32> to vector<8x8xf32>
    %24 = vector.extract_strided_slice %15 {offsets = [0, 0], sizes = [12, 8], strides = [1, 1]} : vector<12x32xf32> to vector<12x8xf32>
    %25 = vector.extract_strided_slice %20 {offsets = [0, 0], sizes = [12, 8], strides = [1, 1]} : vector<12x32xf32> to vector<12x8xf32>
    %cst_25 = arith.constant dense<0.000000e+00> : vector<8x12xf32>
    %26 = tpu.matmul %23, %24, %cst_25 {dimension_numbers = #tpu.dot_dimension_numbers<[1], [1], [0], [0], [0, 0, 1, 0], [], []>} : vector<8x8xf32>, vector<12x8xf32>, vector<8x12xf32> -> vector<8x12xf32>
    %cst_26 = arith.constant 0.353553385 : f32
    %27 = vector.broadcast %cst_26 : f32 to vector<8x12xf32>
    %28 = arith.mulf %26, %27 : vector<8x12xf32>
    %29 = arith.addf %28, %5 : vector<8x12xf32>
    %cst_27 = arith.constant dense<0xFF800000> : vector<8xf32>
    %30 = vector.multi_reduction <maximumf>, %29, %cst_27 [1] : vector<8x12xf32> to vector<8xf32>
    %31 = vector.shape_cast %30 : vector<8xf32> to vector<8x1xf32>
    %32 = vector.broadcast %31 : vector<8x1xf32> to vector<8x12xf32>
    %33 = arith.subf %29, %32 : vector<8x12xf32>
    %34 = math.exp %33 : vector<8x12xf32>
    %cst_28 = arith.constant dense<0.000000e+00> : vector<8xf32>
    %35 = vector.multi_reduction <add>, %34, %cst_28 [1] : vector<8x12xf32> to vector<8xf32>
    %36 = vector.shape_cast %35 : vector<8xf32> to vector<8x1xf32>
    %37 = tpu.reciprocal %36 {approx = true} : vector<8x1xf32> -> vector<8x1xf32>
    %38 = vector.broadcast %37 : vector<8x1xf32> to vector<8x12xf32>
    %39 = arith.mulf %34, %38 : vector<8x12xf32>
    %cst_29 = arith.constant dense<0.000000e+00> : vector<8x8xf32>
    %40 = tpu.matmul %39, %25, %cst_29 {dimension_numbers = #tpu.dot_dimension_numbers<[1], [0], [0], [1], [0, 0, 1, 1], [], []>} : vector<8x12xf32>, vector<12x8xf32>, vector<8x8xf32> -> vector<8x8xf32>
    %41 = vector.extract_strided_slice %21 {offsets = [0, 0], sizes = [8, 32], strides = [1, 1]} : vector<32x32xf32> to vector<8x32xf32>
    %cst_30 = arith.constant dense<0.000000e+00> : vector<8x32xf32>
    %42 = tpu.matmul %40, %41, %cst_30 {dimension_numbers = #tpu.dot_dimension_numbers<[1], [0], [0], [1], [0, 0, 1, 1], [], []>} : vector<8x8xf32>, vector<8x32xf32>, vector<8x32xf32> -> vector<8x32xf32>
    %43 = arith.addf %22, %42 : vector<8x32xf32>
    %44 = vector.extract_strided_slice %10 {offsets = [0, 8], sizes = [8, 8], strides = [1, 1]} : vector<8x32xf32> to vector<8x8xf32>
    %45 = vector.extract_strided_slice %15 {offsets = [0, 8], sizes = [12, 8], strides = [1, 1]} : vector<12x32xf32> to vector<12x8xf32>
    %46 = vector.extract_strided_slice %20 {offsets = [0, 8], sizes = [12, 8], strides = [1, 1]} : vector<12x32xf32> to vector<12x8xf32>
    %cst_31 = arith.constant dense<0.000000e+00> : vector<8x12xf32>
    %47 = tpu.matmul %44, %45, %cst_31 {dimension_numbers = #tpu.dot_dimension_numbers<[1], [1], [0], [0], [0, 0, 1, 0], [], []>} : vector<8x8xf32>, vector<12x8xf32>, vector<8x12xf32> -> vector<8x12xf32>
    %cst_32 = arith.constant 0.353553385 : f32
    %48 = vector.broadcast %cst_32 : f32 to vector<8x12xf32>
    %49 = arith.mulf %47, %48 : vector<8x12xf32>
    %50 = arith.addf %49, %5 : vector<8x12xf32>
    %cst_33 = arith.constant dense<0xFF800000> : vector<8xf32>
    %51 = vector.multi_reduction <maximumf>, %50, %cst_33 [1] : vector<8x12xf32> to vector<8xf32>
    %52 = vector.shape_cast %51 : vector<8xf32> to vector<8x1xf32>
    %53 = vector.broadcast %52 : vector<8x1xf32> to vector<8x12xf32>
    %54 = arith.subf %50, %53 : vector<8x12xf32>
    %55 = math.exp %54 : vector<8x12xf32>
    %cst_34 = arith.constant dense<0.000000e+00> : vector<8xf32>
    %56 = vector.multi_reduction <add>, %55, %cst_34 [1] : vector<8x12xf32> to vector<8xf32>
    %57 = vector.shape_cast %56 : vector<8xf32> to vector<8x1xf32>
    %58 = tpu.reciprocal %57 {approx = true} : vector<8x1xf32> -> vector<8x1xf32>
    %59 = vector.broadcast %58 : vector<8x1xf32> to vector<8x12xf32>
    %60 = arith.mulf %55, %59 : vector<8x12xf32>
    %cst_35 = arith.constant dense<0.000000e+00> : vector<8x8xf32>
    %61 = tpu.matmul %60, %46, %cst_35 {dimension_numbers = #tpu.dot_dimension_numbers<[1], [0], [0], [1], [0, 0, 1, 1], [], []>} : vector<8x12xf32>, vector<12x8xf32>, vector<8x8xf32> -> vector<8x8xf32>
    %62 = vector.extract_strided_slice %21 {offsets = [8, 0], sizes = [8, 32], strides = [1, 1]} : vector<32x32xf32> to vector<8x32xf32>
    %cst_36 = arith.constant dense<0.000000e+00> : vector<8x32xf32>
    %63 = tpu.matmul %61, %62, %cst_36 {dimension_numbers = #tpu.dot_dimension_numbers<[1], [0], [0], [1], [0, 0, 1, 1], [], []>} : vector<8x8xf32>, vector<8x32xf32>, vector<8x32xf32> -> vector<8x32xf32>
    %64 = arith.addf %43, %63 : vector<8x32xf32>
    %65 = vector.extract_strided_slice %10 {offsets = [0, 16], sizes = [8, 8], strides = [1, 1]} : vector<8x32xf32> to vector<8x8xf32>
    %66 = vector.extract_strided_slice %15 {offsets = [0, 16], sizes = [12, 8], strides = [1, 1]} : vector<12x32xf32> to vector<12x8xf32>
    %67 = vector.extract_strided_slice %20 {offsets = [0, 16], sizes = [12, 8], strides = [1, 1]} : vector<12x32xf32> to vector<12x8xf32>
    %cst_37 = arith.constant dense<0.000000e+00> : vector<8x12xf32>
    %68 = tpu.matmul %65, %66, %cst_37 {dimension_numbers = #tpu.dot_dimension_numbers<[1], [1], [0], [0], [0, 0, 1, 0], [], []>} : vector<8x8xf32>, vector<12x8xf32>, vector<8x12xf32> -> vector<8x12xf32>
    %cst_38 = arith.constant 0.353553385 : f32
    %69 = vector.broadcast %cst_38 : f32 to vector<8x12xf32>
    %70 = arith.mulf %68, %69 : vector<8x12xf32>
    %71 = arith.addf %70, %5 : vector<8x12xf32>
    %cst_39 = arith.constant dense<0xFF800000> : vector<8xf32>
    %72 = vector.multi_reduction <maximumf>, %71, %cst_39 [1] : vector<8x12xf32> to vector<8xf32>
    %73 = vector.shape_cast %72 : vector<8xf32> to vector<8x1xf32>
    %74 = vector.broadcast %73 : vector<8x1xf32> to vector<8x12xf32>
    %75 = arith.subf %71, %74 : vector<8x12xf32>
    %76 = math.exp %75 : vector<8x12xf32>
    %cst_40 = arith.constant dense<0.000000e+00> : vector<8xf32>
    %77 = vector.multi_reduction <add>, %76, %cst_40 [1] : vector<8x12xf32> to vector<8xf32>
    %78 = vector.shape_cast %77 : vector<8xf32> to vector<8x1xf32>
    %79 = tpu.reciprocal %78 {approx = true} : vector<8x1xf32> -> vector<8x1xf32>
    %80 = vector.broadcast %79 : vector<8x1xf32> to vector<8x12xf32>
    %81 = arith.mulf %76, %80 : vector<8x12xf32>
    %cst_41 = arith.constant dense<0.000000e+00> : vector<8x8xf32>
    %82 = tpu.matmul %81, %67, %cst_41 {dimension_numbers = #tpu.dot_dimension_numbers<[1], [0], [0], [1], [0, 0, 1, 1], [], []>} : vector<8x12xf32>, vector<12x8xf32>, vector<8x8xf32> -> vector<8x8xf32>
    %83 = vector.extract_strided_slice %21 {offsets = [16, 0], sizes = [8, 32], strides = [1, 1]} : vector<32x32xf32> to vector<8x32xf32>
    %cst_42 = arith.constant dense<0.000000e+00> : vector<8x32xf32>
    %84 = tpu.matmul %82, %83, %cst_42 {dimension_numbers = #tpu.dot_dimension_numbers<[1], [0], [0], [1], [0, 0, 1, 1], [], []>} : vector<8x8xf32>, vector<8x32xf32>, vector<8x32xf32> -> vector<8x32xf32>
    %85 = arith.addf %64, %84 : vector<8x32xf32>
    %86 = vector.extract_strided_slice %10 {offsets = [0, 24], sizes = [8, 8], strides = [1, 1]} : vector<8x32xf32> to vector<8x8xf32>
    %87 = vector.extract_strided_slice %15 {offsets = [0, 24], sizes = [12, 8], strides = [1, 1]} : vector<12x32xf32> to vector<12x8xf32>
    %88 = vector.extract_strided_slice %20 {offsets = [0, 24], sizes = [12, 8], strides = [1, 1]} : vector<12x32xf32> to vector<12x8xf32>
    %cst_43 = arith.constant dense<0.000000e+00> : vector<8x12xf32>
    %89 = tpu.matmul %86, %87, %cst_43 {dimension_numbers = #tpu.dot_dimension_numbers<[1], [1], [0], [0], [0, 0, 1, 0], [], []>} : vector<8x8xf32>, vector<12x8xf32>, vector<8x12xf32> -> vector<8x12xf32>
    %cst_44 = arith.constant 0.353553385 : f32
    %90 = vector.broadcast %cst_44 : f32 to vector<8x12xf32>
    %91 = arith.mulf %89, %90 : vector<8x12xf32>
    %92 = arith.addf %91, %5 : vector<8x12xf32>
    %cst_45 = arith.constant dense<0xFF800000> : vector<8xf32>
    %93 = vector.multi_reduction <maximumf>, %92, %cst_45 [1] : vector<8x12xf32> to vector<8xf32>
    %94 = vector.shape_cast %93 : vector<8xf32> to vector<8x1xf32>
    %95 = vector.broadcast %94 : vector<8x1xf32> to vector<8x12xf32>
    %96 = arith.subf %92, %95 : vector<8x12xf32>
    %97 = math.exp %96 : vector<8x12xf32>
    %cst_46 = arith.constant dense<0.000000e+00> : vector<8xf32>
    %98 = vector.multi_reduction <add>, %97, %cst_46 [1] : vector<8x12xf32> to vector<8xf32>
    %99 = vector.shape_cast %98 : vector<8xf32> to vector<8x1xf32>
    %100 = tpu.reciprocal %99 {approx = true} : vector<8x1xf32> -> vector<8x1xf32>
    %101 = vector.broadcast %100 : vector<8x1xf32> to vector<8x12xf32>
    %102 = arith.mulf %97, %101 : vector<8x12xf32>
    %cst_47 = arith.constant dense<0.000000e+00> : vector<8x8xf32>
    %103 = tpu.matmul %102, %88, %cst_47 {dimension_numbers = #tpu.dot_dimension_numbers<[1], [0], [0], [1], [0, 0, 1, 1], [], []>} : vector<8x12xf32>, vector<12x8xf32>, vector<8x8xf32> -> vector<8x8xf32>
    %104 = vector.extract_strided_slice %21 {offsets = [24, 0], sizes = [8, 32], strides = [1, 1]} : vector<32x32xf32> to vector<8x32xf32>
    %cst_48 = arith.constant dense<0.000000e+00> : vector<8x32xf32>
    %105 = tpu.matmul %103, %104, %cst_48 {dimension_numbers = #tpu.dot_dimension_numbers<[1], [0], [0], [1], [0, 0, 1, 1], [], []>} : vector<8x8xf32>, vector<8x32xf32>, vector<8x32xf32> -> vector<8x32xf32>
    %106 = arith.addf %85, %105 : vector<8x32xf32>
    %c0_49 = arith.constant 0 : index
    %c0_50 = arith.constant 0 : index
    %107 = vector.load %arg11[%c0_49, %c0_50] : memref<1x32xf32, #tpu.memory_space<vmem>>, vector<1x32xf32>
    %108 = vector.broadcast %107 : vector<1x32xf32> to vector<8x32xf32>
    %109 = arith.addf %106, %108 : vector<8x32xf32>
    %110 = arith.addf %109, %1 : vector<8x32xf32>
    %cst_51 = arith.constant dense<0.000000e+00> : vector<8xf32>
    %111 = vector.multi_reduction <add>, %110, %cst_51 [1] : vector<8x32xf32> to vector<8xf32>
    %112 = vector.shape_cast %111 : vector<8xf32> to vector<8x1xf32>
    %cst_52 = arith.constant 3.200000e+01 : f32
    %113 = vector.broadcast %cst_52 : f32 to vector<8x1xf32>
    %114 = arith.divf %112, %113 : vector<8x1xf32>
    %115 = vector.broadcast %114 : vector<8x1xf32> to vector<8x32xf32>
    %116 = arith.subf %110, %115 : vector<8x32xf32>
    %117 = arith.mulf %116, %116 : vector<8x32xf32>
    %cst_53 = arith.constant dense<0.000000e+00> : vector<8xf32>
    %118 = vector.multi_reduction <add>, %117, %cst_53 [1] : vector<8x32xf32> to vector<8xf32>
    %119 = vector.shape_cast %118 : vector<8xf32> to vector<8x1xf32>
    %cst_54 = arith.constant 3.200000e+01 : f32
    %120 = vector.broadcast %cst_54 : f32 to vector<8x1xf32>
    %121 = arith.divf %119, %120 : vector<8x1xf32>
    %122 = vector.broadcast %114 : vector<8x1xf32> to vector<8x32xf32>
    %123 = arith.subf %110, %122 : vector<8x32xf32>
    %cst_55 = arith.constant 9.99999997E-7 : f32
    %124 = vector.broadcast %cst_55 : f32 to vector<8x1xf32>
    %125 = arith.addf %121, %124 : vector<8x1xf32>
    %126 = math.rsqrt %125 : vector<8x1xf32>
    %127 = vector.broadcast %126 : vector<8x1xf32> to vector<8x32xf32>
    %128 = arith.mulf %123, %127 : vector<8x32xf32>
    %c0_56 = arith.constant 0 : index
    %c0_57 = arith.constant 0 : index
    %129 = vector.load %arg12[%c0_56, %c0_57] : memref<1x32xf32, #tpu.memory_space<vmem>>, vector<1x32xf32>
    %130 = vector.broadcast %129 : vector<1x32xf32> to vector<8x32xf32>
    %131 = arith.mulf %128, %130 : vector<8x32xf32>
    %c0_58 = arith.constant 0 : index
    %c0_59 = arith.constant 0 : index
    %132 = vector.load %arg13[%c0_58, %c0_59] : memref<1x32xf32, #tpu.memory_space<vmem>>, vector<1x32xf32>
    %133 = vector.broadcast %132 : vector<1x32xf32> to vector<8x32xf32>
    %134 = arith.addf %131, %133 : vector<8x32xf32>
    %c0_60 = arith.constant 0 : index
    %c0_61 = arith.constant 0 : index
    %135 = vector.load %arg14[%c0_60, %c0_61] : memref<32x64xf32, #tpu.memory_space<vmem>>, vector<32x64xf32>
    %cst_62 = arith.constant dense<0.000000e+00> : vector<8x64xf32>
    %136 = tpu.matmul %134, %135, %cst_62 {dimension_numbers = #tpu.dot_dimension_numbers<[1], [0], [0], [1], [0, 0, 1, 1], [], []>} : vector<8x32xf32>, vector<32x64xf32>, vector<8x64xf32> -> vector<8x64xf32>
    %c0_63 = arith.constant 0 : index
    %c0_64 = arith.constant 0 : index
    %137 = vector.load %arg15[%c0_63, %c0_64] : memref<1x64xf32, #tpu.memory_space<vmem>>, vector<1x64xf32>
    %138 = vector.broadcast %137 : vector<1x64xf32> to vector<8x64xf32>
    %139 = arith.addf %136, %138 : vector<8x64xf32>
    %cst_65 = arith.constant 0.000000e+00 : f32
    %140 = vector.broadcast %cst_65 : f32 to vector<8x64xf32>
    %141 = arith.maximumf %139, %140 : vector<8x64xf32>
    %c0_66 = arith.constant 0 : index
    %c0_67 = arith.constant 0 : index
    %142 = vector.load %arg16[%c0_66, %c0_67] : memref<64x32xf32, #tpu.memory_space<vmem>>, vector<64x32xf32>
    %cst_68 = arith.constant dense<0.000000e+00> : vector<8x32xf32>
    %143 = tpu.matmul %141, %142, %cst_68 {dimension_numbers = #tpu.dot_dimension_numbers<[1], [0], [0], [1], [0, 0, 1, 1], [], []>} : vector<8x64xf32>, vector<64x32xf32>, vector<8x32xf32> -> vector<8x32xf32>
    %c0_69 = arith.constant 0 : index
    %c0_70 = arith.constant 0 : index
    %144 = vector.load %arg17[%c0_69, %c0_70] : memref<1x32xf32, #tpu.memory_space<vmem>>, vector<1x32xf32>
    %145 = vector.broadcast %144 : vector<1x32xf32> to vector<8x32xf32>
    %146 = arith.addf %143, %145 : vector<8x32xf32>
    %147 = arith.addf %146, %134 : vector<8x32xf32>
    %cst_71 = arith.constant dense<0.000000e+00> : vector<8xf32>
    %148 = vector.multi_reduction <add>, %147, %cst_71 [1] : vector<8x32xf32> to vector<8xf32>
    %149 = vector.shape_cast %148 : vector<8xf32> to vector<8x1xf32>
    %cst_72 = arith.constant 3.200000e+01 : f32
    %150 = vector.broadcast %cst_72 : f32 to vector<8x1xf32>
    %151 = arith.divf %149, %150 : vector<8x1xf32>
    %152 = vector.broadcast %151 : vector<8x1xf32> to vector<8x32xf32>
    %153 = arith.subf %147, %152 : vector<8x32xf32>
    %154 = arith.mulf %153, %153 : vector<8x32xf32>
    %cst_73 = arith.constant dense<0.000000e+00> : vector<8xf32>
    %155 = vector.multi_reduction <add>, %154, %cst_73 [1] : vector<8x32xf32> to vector<8xf32>
    %156 = vector.shape_cast %155 : vector<8xf32> to vector<8x1xf32>
    %cst_74 = arith.constant 3.200000e+01 : f32
    %157 = vector.broadcast %cst_74 : f32 to vector<8x1xf32>
    %158 = arith.divf %156, %157 : vector<8x1xf32>
    %159 = vector.broadcast %151 : vector<8x1xf32> to vector<8x32xf32>
    %160 = arith.subf %147, %159 : vector<8x32xf32>
    %cst_75 = arith.constant 9.99999997E-7 : f32
    %161 = vector.broadcast %cst_75 : f32 to vector<8x1xf32>
    %162 = arith.addf %158, %161 : vector<8x1xf32>
    %163 = math.rsqrt %162 : vector<8x1xf32>
    %164 = vector.broadcast %163 : vector<8x1xf32> to vector<8x32xf32>
    %165 = arith.mulf %160, %164 : vector<8x32xf32>
    %c0_76 = arith.constant 0 : index
    %c0_77 = arith.constant 0 : index
    %166 = vector.load %arg18[%c0_76, %c0_77] : memref<1x32xf32, #tpu.memory_space<vmem>>, vector<1x32xf32>
    %167 = vector.broadcast %166 : vector<1x32xf32> to vector<8x32xf32>
    %168 = arith.mulf %165, %167 : vector<8x32xf32>
    %c0_78 = arith.constant 0 : index
    %c0_79 = arith.constant 0 : index
    %169 = vector.load %arg19[%c0_78, %c0_79] : memref<1x32xf32, #tpu.memory_space<vmem>>, vector<1x32xf32>
    %170 = vector.broadcast %169 : vector<1x32xf32> to vector<8x32xf32>
    %171 = arith.addf %168, %170 : vector<8x32xf32>
    %c0_80 = arith.constant 0 : index
    %c0_81 = arith.constant 0 : index
    %c0_82 = arith.constant 0 : index
    %172 = vector.load %arg20[%c0_80, %c0_81, %c0_82] : memref<1x8x32xf32, #tpu.memory_space<vmem>>, vector<1x8x32xf32>
    %173 = vector.shape_cast %172 : vector<1x8x32xf32> to vector<8x32xf32>
    %174 = vector.shape_cast %171 : vector<8x32xf32> to vector<1x8x32xf32>
    tpu.vector_store %arg20[%c0_80, %c0_81, %c0_82], %174 {strides = array<i32>} : memref<1x8x32xf32, #tpu.memory_space<vmem>>, vector<1x8x32xf32>,
    return
  }
  func.func @transform_0(%arg0: i32) -> (i32, i32, i32) {
    %c0_i32 = arith.constant 0 : i32
    %c0_i32_0 = arith.constant 0 : i32
    %c0_i32_1 = arith.constant 0 : i32
    return %arg0, %c0_i32, %c0_i32_0 : i32, i32, i32
  }
  func.func @transform_1(%arg0: i32) -> (i32, i32, i32) {
    %c0_i32 = arith.constant 0 : i32
    %c0_i32_0 = arith.constant 0 : i32
    %c0_i32_1 = arith.constant 0 : i32
    return %arg0, %c0_i32, %c0_i32_0 : i32, i32, i32
  }
  func.func @transform_2(%arg0: i32) -> (i32, i32, i32) {
    %c0_i32 = arith.constant 0 : i32
    %c0_i32_0 = arith.constant 0 : i32
    %c0_i32_1 = arith.constant 0 : i32
    return %arg0, %c0_i32, %c0_i32_0 : i32, i32, i32
  }
  func.func @transform_3(%arg0: i32) -> (i32, i32) {
    %c0_i32 = arith.constant 0 : i32
    %c0_i32_0 = arith.constant 0 : i32
    %c0_i32_1 = arith.constant 0 : i32
    return %c0_i32, %c0_i32_0 : i32, i32
  }
  func.func @transform_4(%arg0: i32) -> (i32, i32) {
    %c0_i32 = arith.constant 0 : i32
    %c0_i32_0 = arith.constant 0 : i32
    %c0_i32_1 = arith.constant 0 : i32
    return %c0_i32, %c0_i32_0 : i32, i32
  }
  func.func @transform_5(%arg0: i32) -> (i32, i32) {
    %c0_i32 = arith.constant 0 : i32
    %c0_i32_0 = arith.constant 0 : i32
    %c0_i32_1 = arith.constant 0 : i32
    return %c0_i32, %c0_i32_0 : i32, i32
  }
  func.func @transform_6(%arg0: i32) -> (i32, i32) {
    %c0_i32 = arith.constant 0 : i32
    %c0_i32_0 = arith.constant 0 : i32
    %c0_i32_1 = arith.constant 0 : i32
    return %c0_i32, %c0_i32_0 : i32, i32
  }
  func.func @transform_7(%arg0: i32) -> (i32, i32) {
    %c0_i32 = arith.constant 0 : i32
    %c0_i32_0 = arith.constant 0 : i32
    %c0_i32_1 = arith.constant 0 : i32
    return %c0_i32, %c0_i32_0 : i32, i32
  }
  func.func @transform_8(%arg0: i32) -> (i32, i32) {
    %c0_i32 = arith.constant 0 : i32
    %c0_i32_0 = arith.constant 0 : i32
    %c0_i32_1 = arith.constant 0 : i32
    return %c0_i32, %c0_i32_0 : i32, i32
  }
  func.func @transform_9(%arg0: i32) -> (i32, i32) {
    %c0_i32 = arith.constant 0 : i32
    %c0_i32_0 = arith.constant 0 : i32
    %c0_i32_1 = arith.constant 0 : i32
    return %c0_i32, %c0_i32_0 : i32, i32
  }
  func.func @transform_10(%arg0: i32) -> (i32, i32) {
    %c0_i32 = arith.constant 0 : i32
    %c0_i32_0 = arith.constant 0 : i32
    %c0_i32_1 = arith.constant 0 : i32
    return %c0_i32, %c0_i32_0 : i32, i32
  }
  func.func @transform_11(%arg0: i32) -> (i32, i32) {
    %c0_i32 = arith.constant 0 : i32
    %c0_i32_0 = arith.constant 0 : i32
    %c0_i32_1 = arith.constant 0 : i32
    return %c0_i32, %c0_i32_0 : i32, i32
  }
  func.func @transform_12(%arg0: i32) -> (i32, i32) {
    %c0_i32 = arith.constant 0 : i32
    %c0_i32_0 = arith.constant 0 : i32
    %c0_i32_1 = arith.constant 0 : i32
    return %c0_i32, %c0_i32_0 : i32, i32
  }
  func.func @transform_13(%arg0: i32) -> (i32, i32) {
    %c0_i32 = arith.constant 0 : i32
    %c0_i32_0 = arith.constant 0 : i32
    %c0_i32_1 = arith.constant 0 : i32
    return %c0_i32, %c0_i32_0 : i32, i32
  }
  func.func @transform_14(%arg0: i32) -> (i32, i32) {
    %c0_i32 = arith.constant 0 : i32
    %c0_i32_0 = arith.constant 0 : i32
    %c0_i32_1 = arith.constant 0 : i32
    return %c0_i32, %c0_i32_0 : i32, i32
  }
  func.func @transform_15(%arg0: i32) -> (i32, i32) {
    %c0_i32 = arith.constant 0 : i32
    %c0_i32_0 = arith.constant 0 : i32
    %c0_i32_1 = arith.constant 0 : i32
    return %c0_i32, %c0_i32_0 : i32, i32
  }
  func.func @transform_16(%arg0: i32) -> (i32, i32) {
    %c0_i32 = arith.constant 0 : i32
    %c0_i32_0 = arith.constant 0 : i32
    %c0_i32_1 = arith.constant 0 : i32
    return %c0_i32, %c0_i32_0 : i32, i32
  }
  func.func @transform_17(%arg0: i32) -> (i32, i32) {
    %c0_i32 = arith.constant 0 : i32
    %c0_i32_0 = arith.constant 0 : i32
    %c0_i32_1 = arith.constant 0 : i32
    return %c0_i32, %c0_i32_0 : i32, i32
  }
  func.func @transform_18(%arg0: i32) -> (i32, i32) {
    %c0_i32 = arith.constant 0 : i32
    %c0_i32_0 = arith.constant 0 : i32
    %c0_i32_1 = arith.constant 0 : i32
    return %c0_i32, %c0_i32_0 : i32, i32
  }
  func.func @transform_19(%arg0: i32) -> (i32, i32, i32) {
    %c0_i32 = arith.constant 0 : i32
    %c0_i32_0 = arith.constant 0 : i32
    %c0_i32_1 = arith.constant 0 : i32
    return %arg0, %c0_i32, %c0_i32_0 : i32, i32, i32
  }
}

</mosaic_0001>

<bundles_post_ra>
// kernel: decoder_layer_forward.1
= control target key start
LH: loop header
LB: loop body
LE: loop exit
PB: predicated region body
PF: predicated region fallthrough
CT: control target
= control target key end

     0   :  { %s2760_s0 = inlined_call_operand.hbm [shape: f32[2,8,32], index: 0, kind: input, shape index: {}]   ;;  %s2761_s1 = inlined_call_operand.vmem [shape: f32[2,12,32], index: 1, kind: input, shape index: {}]   ;;  %s2762_s2 = inlined_call_operand.vmem [shape: f32[2,8,12], index: 2, kind: input, shape index: {}]   ;;  %s2763_s3 = inlined_call_operand.vmem [shape: f32[32,32], index: 3, kind: input, shape index: {}]   ;;  %s2764_s4 = inlined_call_operand.hbm [shape: f32[1,32], index: 4, kind: input, shape index: {}]   ;;  %s2765_s5 = inlined_call_operand.vmem [shape: f32[32,32], index: 5, kind: input, shape index: {}]   ;;  %s2766_s6 = inlined_call_operand.hbm [shape: f32[1,32], index: 6, kind: input, shape index: {}]   ;;  %s2767_s7 = inlined_call_operand.vmem [shape: f32[32,32], index: 7, kind: input, shape index: {}]   ;;  %s2768_s8 = inlined_call_operand.hbm [shape: f32[1,32], index: 8, kind: input, shape index: {}]   ;;  %s2769_s9 = inlined_call_operand.vmem [shape: f32[32,32], index: 9, kind: input, shape index: {}]   ;;  %s2770_s10 = inlined_call_operand.hbm [shape: f32[1,32], index: 10, kind: input, shape index: {}]   ;;  %s2771_s11 = inlined_call_operand.hbm [shape: f32[1,32], index: 11, kind: input, shape index: {}]   ;;  %s2772_s12 = inlined_call_operand.hbm [shape: f32[1,32], index: 12, kind: input, shape index: {}]   ;;  %s2773_s13 = inlined_call_operand.vmem [shape: f32[32,64], index: 13, kind: input, shape index: {}]   ;;  %s2774_s14 = inlined_call_operand.hbm [shape: f32[1,64], index: 14, kind: input, shape index: {}]   ;;  %s2775_s15 = inlined_call_operand.vmem [shape: f32[64,32], index: 15, kind: input, shape index: {}]   ;;  %s2776_s16 = inlined_call_operand.hbm [shape: f32[1,32], index: 16, kind: input, shape index: {}]   ;;  %s2777_s17 = inlined_call_operand.vmem [shape: f32[1,32], index: 17, kind: input, shape index: {}]   ;;  %s2778_s18 = inlined_call_operand.hbm [shape: f32[1,32], index: 18, kind: input, shape index: {}]   ;;  %s2779_s19 = inlined_call_operand.hbm [shape: f32[2,8,32], index: 19, kind: output, shape index: {}]  }
   0x1   :  { %2785 = sst [smem:[#allocation27_spill]] %s2760_s0 }
   0x2   :  { %2786 = sst [smem:[#allocation28_spill]] %s2761_s1 }
   0x3   :  { %2787 = sst [smem:[#allocation29_spill]] %s2762_s2 }
   0x4   :  { %2788 = sst [smem:[#allocation30_spill]] %s2763_s3 }
   0x5   :  { %2789 = sst [smem:[#allocation31_spill]] %s2764_s4 }
   0x6   :  { %2790 = sst [smem:[#allocation32_spill]] %s2766_s6 }
   0x7   :  { %2791 = sst [smem:[#allocation33_spill]] %s2768_s8 }
   0x8   :  { %2792 = sst [smem:[#allocation34_spill]] %s2770_s10 }
   0x9   :  { %2793 = sst [smem:[#allocation35_spill]] %s2771_s11 }
   0xa   :  { %2794 = sst [smem:[#allocation36_spill]] %s2772_s12 }
   0xb   :  { %2795 = sst [smem:[#allocation37_spill]] %s2774_s14 }
   0xc   :  { %2796 = sst [smem:[#allocation38_spill]] %s2775_s15 }
   0xd   :  { %2797 = sst [smem:[#allocation39_spill]] %s2776_s16 }
   0xe   :  { %2798 = sst [smem:[#allocation40_spill]] %s2777_s17 }
   0xf   :  { %2799 = sst [smem:[#allocation41_spill]] %s2778_s18 }
  0x10   :  { %2800 = sst [smem:[#allocation42_spill]] %s2779_s19 }
  0x11   :  { %24 = vsyncpa [#allocation3], 0 }
  0x12   :  { %26 = vsyncpa [#allocation3 + $0x1], 0 }
  0x13   :  { %27 = vsyncpa [#allocation6], 0 }
  0x14   :  { %28 = vsyncpa [#allocation9], 0 }
  0x15   :  { %29 = vsyncpa [#allocation12], 0 }
  0x16   :  { %30 = vsyncpa [#allocation15], 0 }
  0x17   :  { %31 = vsyncpa [#allocation18], 0 }
  0x18   :  { %32 = vsyncpa [#allocation4], 0 }
  0x19   :  { %34 = vsyncpa [#allocation4 + $0x1], 0  ;;  %s2373_s0 = smov 0   ;;  %s2375_s30 = smov 0  }
  0x1a   :  { %s2377_s20 = smov 0   ;;  %s2379_s21 = smov 0  }
  0x1b LB: > { %s2801_s4 = sld [smem:[#allocation31_spill]]  ;;  %s2397_s23 = sadd.s32 4294967295, %s2258_s21   ;;  %s2258_s21 = sphi %s2379_s21, %s2828_s21   ;;  %s2254_s20 = sphi %s2377_s20, %s2827_s20   ;;  %s2250_s30 = sphi %s2375_s30, %s2826_s30   ;;  %s2246_s0 = sphi %s2373_s0, %s2825_s0  }
  0x1c   : > { %p1631_p0 = scmp.ge.s32.totalorder %s2258_s21, 1  ;;  %p61_p1 = scmp.eq.s32.totalorder %s2397_s23, 0 }
  0x1d   : > { %p485_p2 = scmp.lt.s32.totalorder %s2258_s21, 3  ;;  %s2260_s25 = smov [#allocation5]  }
  0x1e   : > { %s502_s3 = sshll.u32 %s2260_s25, 4  ;;  %s2803_s8 = sld [smem:[#allocation33_spill]]  ;;  %s503_s3 = int_to_ptr.vmem [resolvable:$true] %s502_s3 }
  0x1f   : > { %p2402_p3 = pnand %p1631_p0, %p485_p2  ;;  %s2261_s1 = smov [#allocation8]  }
  0x20   : > { %s532_s22 = sshll.u32 %s2261_s1, 4  ;;  %s2805_s11 = sld [smem:[#allocation35_spill]]  ;;  %s533_s22 = int_to_ptr.vmem [resolvable:$true] %s532_s22 }
  0x21   : > { %s500_s2 = sshll.u32 %s2801_s4, 4  ;;  %p1739_p5 = pneg %p2402_p3  ;;  %s501_s2 = int_to_ptr.hbm [resolvable:$true] %s500_s2 }
  0x22   : > { %s2806_s14 = sld [smem:[#allocation37_spill]]  ;;  %s2262_s17 = smov [#allocation11]  }
  0x23   : > { %p2414_p6 = pnand %p1739_p5, %p61_p1  ;;  %s559_s15 = sshll.u32 %s2262_s17, 4  ;;  %s560_s15 = int_to_ptr.vmem [resolvable:$true] %s559_s15 }
  0x24   : > { %s530_s28 = sshll.u32 %s2803_s8, 4  ;;  %s2263_s1 = smov [#allocation14]   ;;  %s531_s28 = int_to_ptr.hbm [resolvable:$true] %s530_s28 }
  0x25   : > { %1742 = dma.hbm_to_vmem [thread:$0]  (!%p2414_p6), %s501_s2, 16, %s503_s3, [#allocation6]  }
  0x26   : > { %s557_s19 = sshll.u32 %s2805_s11, 4  ;;  %s586_s4 = sshll.u32 %s2263_s1, 4  ;;  %s558_s19 = int_to_ptr.hbm [resolvable:$true] %s557_s19  ;;  %s587_s4 = int_to_ptr.vmem [resolvable:$true] %s586_s4 }
  0x27   : > { %1748 = dma.hbm_to_vmem [thread:$0]  (!%p2414_p6), %s531_s28, 16, %s533_s22, [#allocation9]  }
  0x28   : > { %s584_s8 = sshll.u32 %s2806_s14, 4  ;;  %s2807_s6 = sld [smem:[#allocation32_spill]]  ;;  %s585_s8 = int_to_ptr.hbm [resolvable:$true] %s584_s8 }
  0x29   : > { %1754 = dma.hbm_to_vmem [thread:$0]  (!%p2414_p6), %s558_s19, 16, %s560_s15, [#allocation12]  }
  0x2a   : > { %1760 = dma.hbm_to_vmem [thread:$0]  (!%p2414_p6), %s585_s8, 16, %s587_s4, [#allocation15]  }
  0x2b   : > { %s2808_s10 = sld [smem:[#allocation34_spill]]  ;;  %s2264_s17 = smov [#allocation7]  }
  0x2c   : > { %s517_s26 = sshll.u32 %s2264_s17, 4  ;;  %s2265_s15 = smov [#allocation10]   ;;  %s518_s26 = int_to_ptr.vmem [resolvable:$true] %s517_s26 }
  0x2d   : > { %s547_s19 = sshll.u32 %s2265_s15, 4  ;;  %s2809_s12 = sld [smem:[#allocation36_spill]]  ;;  %s548_s19 = int_to_ptr.vmem [resolvable:$true] %s547_s19 }
  0x2e   : > { %s515_s2 = sshll.u32 %s2807_s6, 4  ;;  %s2810_s16 = sld [smem:[#allocation39_spill]]  ;;  %s516_s2 = int_to_ptr.hbm [resolvable:$true] %s515_s2 }
  0x2f   : > { %1745 = dma.hbm_to_vmem [thread:$0]  (!%p2414_p6), %s516_s2, 16, %s518_s26, [#allocation6]  }
  0x30   : > { %s2266_s3 = smov [#allocation13]   ;;  %s2267_s28 = smov [#allocation16]  }
  0x31   : > { %s545_s22 = sshll.u32 %s2808_s10, 4  ;;  %s571_s2 = sshll.u32 %s2266_s3, 4  ;;  %s546_s22 = int_to_ptr.hbm [resolvable:$true] %s545_s22  ;;  %s572_s2 = int_to_ptr.vmem [resolvable:$true] %s571_s2 }
  0x32   : > { %1751 = dma.hbm_to_vmem [thread:$0]  (!%p2414_p6), %s546_s22, 16, %s548_s19, [#allocation9]  }
  0x33   : > { %s569_s1 = sshll.u32 %s2809_s12, 4  ;;  %s601_s22 = sshll.u32 %s2267_s28, 4  ;;  %s570_s1 = int_to_ptr.hbm [resolvable:$true] %s569_s1  ;;  %s602_s22 = int_to_ptr.vmem [resolvable:$true] %s601_s22 }
  0x34   : > { %s599_s25 = sshll.u32 %s2810_s16, 4  ;;  %s2811_s18 = sld [smem:[#allocation41_spill]]  ;;  %s600_s25 = int_to_ptr.hbm [resolvable:$true] %s599_s25 }
  0x35   : > { %1757 = dma.hbm_to_vmem [thread:$0]  (!%p2414_p6), %s570_s1, 16, %s572_s2, [#allocation12]  }
  0x36   : > { %1763 = dma.hbm_to_vmem [thread:$0]  (!%p2414_p6), %s600_s25, 16, %s602_s22, [#allocation15]  }
  0x37   : > { %s2268_s19 = smov [#allocation17]   ;;  %s1630_s27 = sadd.s32 4294967294, %s2258_s21  }
  0x38   : > { %s616_s11 = sshll.u32 %s2268_s19, 4  ;;  %s2459_s1 = sadd.s32 1, %s2258_s21   ;;  %s617_s11 = int_to_ptr.vmem [resolvable:$true] %s616_s11 }
  0x39   : > { %s47_s8 = sadd.s32 1, %s2254_s20  ;;  %s44_s4 = ssub.s32 %s2258_s21, %s2459_s1 }
  0x3a   : > { %s614_s15 = sshll.u32 %s2811_s18, 4  ;;  %p54_p7 = scmp.ne.s32.totalorder %s2254_s20, %s2250_s30  ;;  %s615_s15 = int_to_ptr.hbm [resolvable:$true] %s614_s15 }
  0x3b   : > { %1766 = dma.hbm_to_vmem [thread:$0]  (!%p2414_p6), %s615_s15, 16, %s617_s11, [#allocation18]  }
  0x3c   : > { %p45_p8 = scmp.eq.s32.totalorder %s44_s4, 0  ;;  %p55_p9 = scmp.eq.s32.totalorder %s2258_s21, 0 }
  0x3d   : > { %p60_p10 = scmp.ne.s32.totalorder %s2250_s30, %s2246_s0  ;;  %p472_p11 = scmp.eq.s32.totalorder %s2397_s23, 1 }
  0x3e   : > { %s2471_s25 = scalar_select %p45_p8, %s2254_s20, %s47_s8  }
  0x3f   : > { %p2475_p12 = por %p61_p1, %p60_p10  ;;  %p2479_p13 = por %p472_p11, %p54_p7 }
  0x40   : > { %p478_p0 = scmp.eq.s32.totalorder %s1630_s27, 1  ;;  %p56_p2 = por %p55_p9, %p54_p7 }
  0x41   : > { %s627_s2 = sand.u32 1, %s2254_s20   ;;  %p1784_p6 = scmp.lt.s32.totalorder %s2258_s21, 2 }
  0x42   : > { %p2484_p5 = por %p478_p0, %p60_p10  ;;  %s1642_s22 = sshll.u32 %s627_s2, 3 }
  0x43   : > { %s1643_s17 = sshll.u32 %s2258_s21, 3  ;;  %s2815_s19 = sld [smem:[#allocation27_spill]] }
  0x44   : > { %s631_s4 = scalar_lea.vmem [#allocation2], %s1642_s22  ;;  %p2493_p8 = pnand %p1784_p6, %p56_p2 }
  0x45   : > { %s639_s6 = sshll.u32 %s631_s4, 4  ;;  %s628_s10 = scalar_lea.sflag [#allocation3], %s627_s2  ;;  %s640_s6 = int_to_ptr.vmem [resolvable:$true] %s639_s6 }
  0x46   : > { %p2146_p9 = pneg %p2493_p8 }
  0x49   : > { %s635_s11 = scalar_lea.hbm %s2815_s19, %s1643_s17  ;;  %s2149_s22 = scalar_lea.hbm %s2815_s19, 16 }
  0x4a   : > { %s637_s8 = sshll.u32 %s635_s11, 4  ;;  %s638_s8 = int_to_ptr.hbm [resolvable:$true] %s637_s8 }
  0x4b   : > { %s2142_s12 = sshra.s32 %s638_s8, 4  ;;  %s2143_s12 = int_to_ptr.hbm [resolvable:$true] %s2142_s12 }
  0x4c   : > { %s2144_s14 = scalar_lea.hbm %s2143_s12, 8  ;;  %p2150_p0 = scmp.lt.s32.totalorder %s2143_s12, %s2815_s19 }
  0x4d   : > { %p2145_p7 = scmp.ne.s32.totalorder %s2143_s12, %s2144_s14  ;;  %p2151_p2 = scmp.lt.s32.totalorder %s2149_s22, %s2144_s14 }
  0x4f   : > { %p2147_p10 = pnand %p2146_p9, %p2145_p7  ;;  %p2152_p6 = por %p2151_p2, %p2150_p0 }
  0x51   : > { %p2148_p11 = pneg %p2147_p10 }
  0x53   : > { %p2153_p4 = pnand %p2152_p6, %p2148_p11 }
  0x55   : > { %2156 = shalt.err (!%p2153_p4)
}
  0x56   : > { %1770 = dma.hbm_to_vmem [thread:$0]  (!%p2493_p8), %s638_s8, 128, %s640_s6, %s628_s10  }
  0x57   : > { %663 = sbr.rel (%p2402_p3) target bundleno = 2250 (0x8ca), region = 96  ;;  %s2510_s2 = sand.u32 (!%p2402_p3), 1, %s2250_s30  }
  0x58   : > { %s2784_s4 = sshll.u32 (!%p2402_p3), %s2510_s2, 3  ;;  %s666_s17 = scalar_lea.sflag (!%p2402_p3), [#allocation3], %s2510_s2 }
  0x59   : > { %s2516_s12 = scalar_lea.vmem (!%p2402_p3), [#allocation2], %s2784_s4 }
  0x5c   : > { %2217 = dma.done.wait (%p2475_p12), %s666_s17, 128  }
  0x5d   : > { %2219 = vsyncadd (%p2475_p12), %s666_s17, 4294967168 }
  0x5e   : > { %2221 = dma.done.wait (%p61_p1), [#allocation6], 32  }
  0x5f   : > { %2223 = vsyncadd (%p61_p1), [#allocation6], 4294967264 }
  0x60   : > { %2225 = dma.done.wait (%p61_p1), [#allocation9], 32  }
  0x61   : > { %2227 = vsyncadd (%p61_p1), [#allocation9], 4294967264 }
  0x62   : > { %2229 = dma.done.wait (%p61_p1), [#allocation12], 32  }
  0x63   : > { %2231 = vsyncadd (%p61_p1), [#allocation12], 4294967264 }
  0x64   : > { %2233 = dma.done.wait (%p61_p1), [#allocation15], 32  }
  0x65   : > { %2235 = vsyncadd (%p61_p1), [#allocation15], 4294967264 }
  0x66   : > { %2237 = dma.done.wait (%p61_p1), [#allocation18], 16  }
  0x67   : > { %2239 = vsyncadd (%p61_p1), [#allocation18], 4294967280  ;;  %p779_p3 = scmp.lt.s32.totalorder %s2397_s23, 1  ;;  %v827_v0 = vld [vmem:[%s2765_s5 + $0x18] sm:$0xff]  ;;  %v826_v1 = vld [vmem:[%s2765_s5 + $0x10] sm:$0xff]  ;;  %s2817_s22 = sld [smem:[#allocation28_spill]] }
  0x68   : > { %850 = vmatpush.msra.mxu1 %v827_v0  ;;  %s2818_s4 = sld [smem:[#allocation30_spill]]  ;;  %v825_v3 = vld [vmem:[%s2765_s5 + $0x8] sm:$0xff]  ;;  %v824_v4 = vld [vmem:[%s2765_s5] sm:$0xff]  ;;  %vm800_vm0 = vcmask 261120   ;;  %v864_v11 = vld [vmem:[%s2767_s7 + $0x18] sm:$0xff]  ;;  %vm896_vm1 = vcmask 64512  }
  0x69   : > { %s2544_s6 = scalar_select %p779_p3, %s2397_s23, 1  ;;  %v2575_v9 = vld [vmem:[%s2516_s12] sm:$0xff]  ;;  %v863_v12 = vld [vmem:[%s2767_s7 + $0x10] sm:$0xff]  ;;  %1695 = vmatpush.msra.mxu3 %v864_v11  ;;  %881 = vmatpush.msra.mxu2 %v864_v11  ;;  %vm943_vm2 = vcmask 1043456   ;;  %vm928_vm3 = vcmask 97280   ;;  %vm1376_vm8 = vcmask 523264  }
  0x6a   : > { %851 = vmatpush.msra.mxu1 %v826_v1  ;;  %v862_v13 = vld [vmem:[%s2767_s7 + $0x8] sm:$0xff]  ;;  %v861_v14 = vld [vmem:[%s2767_s7] sm:$0xff]  ;;  %v1840_v17 = vld [vmem:[#allocation7] ss:$0 sm:$0xff]  ;;  %s2270_s27 = smov 120   ;;  %s2271_s26 = smov 112  }
  0x6b   : > { %s1694_s10 = sshll.u32 %s2544_s6, 4  ;;  %1696 = vmatpush.msra.mxu3 %v863_v12  ;;  %882 = vmatpush.msra.mxu2 %v863_v12  ;;  %v892_v16 = vld [vmem:[%s2769_s9] sm:$0xff]  ;;  %v1841_v20 = vld [vmem:[#allocation5] ss:$0 sm:$0xff]  ;;  %v1842_v25 = vld [vmem:[#allocation8] ss:$0 sm:$0xff] }
  0x6c   : > { %852 = vmatpush.msra.mxu1 %v825_v3  ;;  %s2819_s11 = sld [smem:[#allocation29_spill]]  ;;  %s1691_s14 = sshll.u32 %s2397_s23, 3 }
  0x6d   : > { %s783_s15 = scalar_lea.vmem %s2817_s22, %s1694_s10  ;;  %1697 = vmatpush.msra.mxu3 %v862_v13  ;;  %883 = vmatpush.msra.mxu2 %v862_v13  ;;  %s2269_s10 = smov 104  }
  0x6e   : > { %v795_v2 = vld [vmem:[%s2818_s4 + $0x18] sm:$0xff]  ;;  %v794_v5 = vld [vmem:[%s2818_s4 + $0x10] sm:$0xff]  ;;  %v789_v6 = vld [vmem:[%s783_s15] sm:$0xff]  ;;  %853 = vmatpush.msra.mxu1 %v824_v4  ;;  %s1658_s22 = sshll.u32 %s2544_s6, 3  ;;  %s2820_s12 = sld [smem:[#allocation38_spill]] }
  0x6f   : > { %816 = vmatpush.msra.mxu0 %v795_v2  ;;  %v793_v7 = vld [vmem:[%s2818_s4 + $0x8] sm:$0xff]  ;;  %v792_v8 = vld [vmem:[%s2818_s4] sm:$0xff]  ;;  %1660 = vmatmul.msk.f32.vlgmr.msra.gmra.mxu1 %vm800_vm0, %v789_v6  ;;  %s2821_s29 = sld [smem:[#allocation40_spill]] }
  0x70   : > { %v790_v10 = vld [vmem:[%s783_s15 + $0x8] sm:$0xf]  ;;  %1698 = vmatpush.msra.mxu3 %v861_v14  ;;  %884 = vmatpush.msra.mxu2 %v861_v14 }
  0x71   : > { %817 = vmatpush.msra.mxu0 %v794_v5  ;;  %1663 = vmatmul.msk.f32.vlgmr.msra.gmra.mxu3 %vm800_vm0, %v790_v10 }
  0x72   : > { %1662 = vmatmul.msk.f32.vlgmr.msra.gmra.mxu2 %vm800_vm0, %v789_v6  ;;  %s787_s17 = scalar_lea.vmem %s2819_s11, %s1658_s22  ;;  %s2823_s22 = sshll.u32 %s2510_s2, 3 }
  0x73   : > { %818 = vmatpush.msra.mxu0 %v793_v7  ;;  %1084 = vmatpush.msrb.mxu2 %v892_v16  ;;  %v791_v33 = vld [vmem:[%s787_s17] sm:$0xff]  ;;  %s778_s16 = scalar_lea.vmem [#allocation19], %s2823_s22  ;;  %s1435_s11 = scalar_lea.sflag [#allocation4], %s2510_s2 }
  0x74   : > { %s1447_s18 = sshll.u32 %s778_s16, 4  ;;  %s1448_s18 = int_to_ptr.vmem [resolvable:$true] %s1447_s18 }
  0x75   : > { %819 = vmatpush.msra.mxu0 %v792_v8 }
  0x76   : > { %1659 = vmatmul.msk.f32.vlgmr.msra.gmra.mxu0 %vm800_vm0, %v2575_v9 }
  0x77   : > { %1661 = vmatmul.msk.f32.gmra.mxu1 %vm800_vm0, %v790_v10 }
  0xec   : > { %v855_v15 = vpop.f32.mrf.mxu1 }
  0xed   : > { %v856_v22 = vadd.f32 %v1840_v17, %v855_v15 }
  0xf3   : > { %v821_v21 = vpop.f32.mrf.mxu0 }
  0xf4   : > { %v858_v18 = vpop.f32.mrf.mxu1  ;;  %v822_v23 = vadd.f32 %v1841_v20, %v821_v21  ;;  %v889_v26 = vpop.f32.mrf.mxu3 }
  0xf5   : > { %v859_v19 = vadd.f32 %v1840_v17, %v858_v18  ;;  %v2610_v27 = vadd.f32 %v1842_v25, %v889_v26  ;;  %v886_v46 = vpop.f32.mrf.mxu2  ;;  %v893_v26 = vld [vmem:[%s2769_s9 + $0x8] sm:$0xff] }
  0xf6   : > { %v2626_v47 = vadd.f32 %v1842_v25, %v886_v46  ;;  %1061 = vmatpush.msrb.mxu1 %v893_v26 }
  0xf7   : > { %1192 = vrot.lane.b32.xlu2 %v859_v19, %s2269_s10  ;;  %971 = vrot.lane.b32.xlu1 %v859_v19, %s2270_s27 }
  0xf8   : > { %1664 = vmatpush.xpose.msk.msrb.mxu3 %vm896_vm1, %v859_v19  ;;  %1667 = vmatpush.msk.msrb.mxu0 %vm943_vm2, %v2610_v27 }
  0xfa   : > { %962 = vmatpush.msrb.mxu0 %v2626_v47 }
  0xfc   : > { %1665 = vmatpush.xpose.msk.msrb.mxu3 %vm896_vm1, %v856_v22 }
  0xff   : > { %1666 = vmatmul.msk.f32.vlgmr.msrb.gmra.mxu3 %vm896_vm1, %v822_v23  ;;  %969 = vrot.lane.b32.xlu1 %v856_v22, %s2270_s27 }
 0x100   : > { %967 = vrot.lane.b32.xlu2 %v822_v23, %s2270_s27 }
 0x107   : > { %1190 = vrot.lane.b32.xlu1 %v856_v22, %s2269_s10 }
 0x108   : > { %1188 = vrot.lane.b32.xlu2 %v822_v23, %s2269_s10 }
 0x10f   : > { %1091 = vrot.lane.b32.xlu1 %v856_v22, %s2271_s26 }
 0x110   : > { %1089 = vrot.lane.b32.xlu2 %v822_v23, %s2271_s26 }
 0x151   : > { %v1193_v24 = vpop.permute.xlu2 %1192 }
 0x152   : > { %1682 = vmatpush.xpose.msk.msra.mxu2 %vm896_vm1, %v1193_v24 }
 0x15a   : > { %v968_v30 = vpop.permute.xlu2 %967 }
 0x162   : > { %v1189_v51 = vpop.permute.xlu2 %1188 }
 0x169   : > { %v972_v28 = vpop.permute.xlu1 %971 }
 0x16a   : > { %1669 = vmatpush.xpose.msk.msra.mxu3 %vm896_vm1, %v972_v28  ;;  %v1090_v54 = vpop.permute.xlu2 %1089 }
 0x171   : > { %v970_v29 = vpop.permute.xlu1 %969 }
 0x172   : > { %1670 = vmatpush.xpose.msk.msra.mxu3 %vm896_vm1, %v970_v29 }
 0x175   : > { %1671 = vmatmul.msk.f32.vlgmr.msra.gmra.mxu3 %vm896_vm1, %v968_v30 }
 0x179   : > { %v1191_v31 = vpop.permute.xlu1 %1190 }
 0x17a   : > { %1683 = vmatpush.xpose.msk.msra.mxu2 %vm896_vm1, %v1191_v31 }
 0x181   : > { %v1092_v53 = vpop.permute.xlu1 %1091 }
 0x182   : > { %v923_v32 = vpop.f32.mrf.mxu3 }
 0x183   : > { %v926_v34 = vmul.f32 0.35355338, %v923_v32 }
 0x185   : > { %v927_v35 = vadd.f32 %v926_v34, %v791_v33  ;;  %v895_v34 = vld [vmem:[%s2769_s9 + $0x18] sm:$0xff] }
 0x187   : > { %v929_v36 = vsel %vm928_vm3, %v927_v35, -inf }
 0x188   : > { %930 = vmax.xlane.f32.xlu0 %v929_v36 }
 0x1f8   : > { %v996_v37 = vpop.f32.mrf.mxu3 }
 0x1f9   : > { %v999_v38 = vmul.f32 0.35355338, %v996_v37 }
 0x1fb   : > { %v931_v39 = vpop.xlane.xlu0 %930  ;;  %v1000_v40 = vadd.f32 %v999_v38, %v791_v33 }
 0x1fc   : > { %v932_v41 = vsub.f32 %v927_v35, %v931_v39  ;;  %v894_v35 = vld [vmem:[%s2769_s9 + $0x10] sm:$0xff] }
 0x1fd   : > { %v1001_v42 = vsel %vm928_vm3, %v1000_v40, -inf  ;;  %1182 = vmatpush.msra.mxu1 %v894_v35 }
 0x1fe   : > { %v933_v43 = vmul.f32 1.442695, %v932_v41  ;;  %1002 = vmax.xlane.f32.xlu1 %v1001_v42  ;;  %v1843_v42 = vld [vmem:[#allocation10] ss:$0 sm:$0xff] }
 0x200   : > { %1850 = vpow2.f32 %v933_v43 }
 0x206   : > { %v1851_v44 = vpop.eup %1850 }
 0x207   : > { %v935_v45 = vsel %vm928_vm3, %v1851_v44, 0.0 }
 0x208   : > { %936 = vadd.xlane.f32.xlu0 %v935_v45 }
 0x217   : > { %1013 = vrot.lane.b32.xlu1 %v2626_v47, %s2270_s27 }
 0x21c   : > { %1093 = vrot.lane.b32.xlu0 %v859_v19, %s2271_s26 }
 0x271   : > { %v1003_v61 = vpop.xlane.xlu1 %1002 }
 0x272   : > { %v1004_v62 = vsub.f32 %v1000_v40, %v1003_v61  ;;  %v1333_v61 = vld [vmem:[%s2773_s13 + $0x8] sm:$0xff] }
 0x274   : > { %v1005_v63 = vmul.f32 1.442695, %v1004_v62  ;;  %v1332_v62 = vld [vmem:[%s2773_s13] sm:$0xff] }
 0x27b   : > { %v937_v48 = vpop.xlane.xlu0 %936 }
 0x27c   : > { %1852 = vrcp.f32 %v937_v48  ;;  %v2272_v48 = vmov 32.0  }
 0x27d   : > { %1854 = vpow2.f32 %v1005_v63  ;;  %v1371_v63 = vld [vmem:[%s2820_s12 + $0x38] sm:$0xff] }
 0x282   : > { %v1853_v49 = vpop.eup %1852 }
 0x283   : > { %v939_v50 = vmul.f32 %v1853_v49, %v1851_v44  ;;  %v1855_v7 = vpop.eup %1854 }
 0x284   : > { %v1007_v8 = vsel %vm928_vm3, %v1855_v7, 0.0 }
 0x285   : > { %1668 = vmatmul.msk.f32.vlgmr.msrb.gmra.mxu0 %vm928_vm3, %v939_v50 }
 0x289   : > { %v1014_v13 = vpop.permute.xlu1 %1013 }
 0x28e   : > { %v1094_v52 = vpop.permute.xlu0 %1093 }
 0x28f   : > { %1676 = vmatpush.xpose.msk.msrb.mxu3 %vm896_vm1, %v1094_v52 }
 0x293   : > { %1677 = vmatpush.xpose.msk.msrb.mxu3 %vm896_vm1, %v1092_v53 }
 0x296   : > { %1678 = vmatmul.msk.f32.vlgmr.msrb.gmra.mxu3 %vm896_vm1, %v1090_v54 }
 0x302   : > { %v964_v55 = vpop.f32.mrf.mxu0 }
 0x303   : > { %1675 = vmatmul.msk.f32.vlgmr.msrb.gmra.mxu2 %vm896_vm1, %v964_v55 }
 0x304   : > { %1388 = vmatpush.msrb.mxu2 %v1371_v63 }
 0x30b   : > { %1684 = vmatmul.msk.f32.vlgmr.msra.gmra.mxu2 %vm896_vm1, %v1189_v51 }
 0x319   : > { %v1118_v56 = vpop.f32.mrf.mxu3 }
 0x31a   : > { %v1121_v57 = vmul.f32 0.35355338, %v1118_v56 }
 0x31c   : > { %v1122_v58 = vadd.f32 %v1121_v57, %v791_v33 }
 0x31e   : > { %v1123_v59 = vsel %vm928_vm3, %v1122_v58, -inf }
 0x31f   : > { %1124 = vmax.xlane.f32.xlu0 %v1123_v59  ;;  %v1335_v59 = vld [vmem:[%s2773_s13 + $0x18] sm:$0xff] }
 0x333   : > { %1015 = vrot.lane.b32.xlu0 %v2610_v27, %s2270_s27  ;;  %s2822_s27 = sld [smem:[#allocation42_spill]] }
 0x339   : > { %s2192_s24 = scalar_lea.hbm %s2822_s27, 16 }
 0x33b   : > { %1233 = vrot.lane.b32.xlu0 %v2626_v47, %s2269_s10 }
 0x343   : > { %1136 = vrot.lane.b32.xlu0 %v2610_v27, %s2271_s26 }
 0x386   : > { %v2644_v60 = vpop.f32.mrf.mxu2 }
 0x38e   : > { %v1217_v0 = vpop.f32.mrf.mxu2 }
 0x38f   : > { %v1220_v1 = vmul.f32 0.35355338, %v1217_v0  ;;  %v1370_v0 = vld [vmem:[%s2820_s12 + $0x30] sm:$0xff] }
 0x390   : > { %1389 = vmatpush.msrb.mxu2 %v1370_v0 }
 0x391   : > { %v1221_v2 = vadd.f32 %v1220_v1, %v791_v33  ;;  %v1369_v1 = vld [vmem:[%s2820_s12 + $0x28] sm:$0xff] }
 0x392   : > { %v1125_v3 = vpop.xlane.xlu0 %1124  ;;  %1390 = vmatpush.msrb.mxu2 %v1369_v1 }
 0x393   : > { %v1126_v4 = vsub.f32 %v1122_v58, %v1125_v3  ;;  %v1222_v5 = vsel %vm928_vm3, %v1221_v2, -inf }
 0x394   : > { %1223 = vmax.xlane.f32.xlu2 %v1222_v5 }
 0x395   : > { %v1127_v6 = vmul.f32 1.442695, %v1126_v4  ;;  %v1368_v4 = vld [vmem:[%s2820_s12 + $0x20] sm:$0xff] }
 0x396   : > { %1391 = vmatpush.msrb.mxu2 %v1368_v4 }
 0x397   : > { %1856 = vpow2.f32 %v1127_v6  ;;  %v1367_v6 = vld [vmem:[%s2820_s12 + $0x18] sm:$0xff] }
 0x398   : > { %1392 = vmatpush.msrb.mxu2 %v1367_v6 }
 0x39c   : > { %1008 = vadd.xlane.f32.xlu2 %v1007_v8 }
 0x39d   : > { %v1857_v10 = vpop.eup %1856 }
 0x39e   : > { %v1129_v11 = vsel %vm928_vm3, %v1857_v10, 0.0 }
 0x3a4   : > { %1130 = vadd.xlane.f32.xlu2 %v1129_v11 }
 0x3a5   : > { %v1016_v12 = vpop.permute.xlu0 %1015 }
 0x3a6   : > { %1672 = vmatpush.msk.msra.mxu0 %vm943_vm2, %v1016_v12 }
 0x3a8   : > { %1038 = vmatpush.msra.mxu0 %v1014_v13 }
 0x3ad   : > { %v1234_v14 = vpop.permute.xlu0 %1233 }
 0x3b5   : > { %v1137_v15 = vpop.permute.xlu0 %1136 }
 0x3b6   : > { %1679 = vmatpush.msk.msrb.mxu0 %vm943_vm2, %v1137_v15 }
 0x3bc   : > { %1235 = vrot.lane.b32.xlu2 %v2610_v27, %s2269_s10 }
 0x407   : > { %v1224_v16 = vpop.xlane.xlu2 %1223 }
 0x408   : > { %v1225_v17 = vsub.f32 %v1221_v2, %v1224_v16 }
 0x40a   : > { %v1226_v18 = vmul.f32 1.442695, %v1225_v17  ;;  %v1845_v17 = vld [vmem:[#allocation13] ss:$0 sm:$0xff] }
 0x40c   : > { %1858 = vpow2.f32 %v1226_v18 }
 0x40f   : > { %v1009_v19 = vpop.xlane.xlu2 %1008 }
 0x410   : > { %1860 = vrcp.f32 %v1009_v19 }
 0x412   : > { %v1859_v20 = vpop.eup %1858 }
 0x413   : > { %v1228_v21 = vsel %vm928_vm3, %v1859_v20, 0.0 }
 0x414   : > { %1229 = vadd.xlane.f32.xlu1 %v1228_v21  ;;  %v1365_v21 = vld [vmem:[%s2820_s12 + $0x8] sm:$0xff] }
 0x416   : > { %v1861_v22 = vpop.eup %1860 }
 0x417   : > { %v1011_v23 = vmul.f32 %v1861_v22, %v1855_v7  ;;  %v1131_v24 = vpop.xlane.xlu2 %1130  ;;  %v1364_v22 = vld [vmem:[%s2820_s12] sm:$0xff] }
 0x419   : > { %1673 = vmatmul.msk.f32.vlgmr.msra.gmra.mxu0 %vm928_vm3, %v1011_v23  ;;  %v1846_v23 = vld [vmem:[#allocation14] ss:$0 sm:$0xff] }
 0x41f   : > { %v1236_v25 = vpop.permute.xlu2 %1235 }
 0x420   : > { %1685 = vmatpush.msk.msra.mxu3 %vm943_vm2, %v1236_v25 }
 0x422   : > { %1258 = vmatpush.msra.mxu3 %v1234_v14  ;;  %v1844_v14 = vld [vmem:[#allocation11] ss:$0 sm:$0xff] }
 0x42d   : > { %1134 = vrot.lane.b32.xlu1 %v2626_v47, %s2271_s26  ;;  %s1445_s26 = scalar_lea.hbm %s2822_s27, %s1691_s14 }
 0x42e   : > { %s1449_s23 = sshll.u32 %s1445_s26, 4  ;;  %s1450_s23 = int_to_ptr.hbm [resolvable:$true] %s1449_s23 }
 0x42f   : > { %s2186_s17 = sshra.s32 %s1450_s23, 4  ;;  %s2187_s17 = int_to_ptr.hbm [resolvable:$true] %s2186_s17 }
 0x430   : > { %s2188_s6 = scalar_lea.hbm %s2187_s17, 8  ;;  %p2193_p8 = scmp.lt.s32.totalorder %s2187_s17, %s2822_s27 }
 0x431   : > { %p2189_p1 = scmp.ne.s32.totalorder %s2187_s17, %s2188_s6  ;;  %p2194_p7 = scmp.lt.s32.totalorder %s2192_s24, %s2188_s6 }
 0x433   : > { %p2190_p4 = pnand %p2189_p1, %p2479_p13  ;;  %p2195_p9 = por %p2194_p7, %p2193_p8 }
 0x435   : > { %p2191_p12 = pneg %p2190_p4 }
 0x437   : > { %p2196_p10 = pnand %p2195_p9, %p2191_p12 }
 0x487   : > { %v1230_v27 = vpop.xlane.xlu1 %1229 }
 0x488   : > { %1862 = vrcp.f32 %v1230_v27  ;;  %v1847_v27 = vld [vmem:[#allocation16] ss:$0 sm:$0xff] }
 0x489   : > { %1864 = vrcp.f32 %v1131_v24 }
 0x48a   : > { %1866 = vrcp.f32 %v2272_v48 }
 0x48e   : > { %v1863_v28 = vpop.eup %1862 }
 0x48f   : > { %v1232_v29 = vmul.f32 %v1863_v28, %v1859_v20  ;;  %v1865_v31 = vpop.eup %1864  ;;  %v1366_v20 = vld [vmem:[%s2820_s12 + $0x10] sm:$0xff] }
 0x490   : > { %v1133_v32 = vmul.f32 %v1865_v31, %v1857_v10  ;;  %v1867_v49 = vpop.eup %1866  ;;  %1393 = vmatpush.msrb.mxu2 %v1366_v20 }
 0x491   : > { %1686 = vmatmul.msk.f32.vlgmr.msra.gmra.mxu3 %vm928_vm3, %v1232_v29  ;;  %v1297_v50 = vmul.f32 32.0, %v1867_v49  ;;  %vm1301_vm4 = vweird.f32 %v1867_v49 }
 0x492   : > { %1394 = vmatpush.msrb.mxu2 %v1365_v21 }
 0x493   : > { %v1298_v51 = vsub.f32 1.0, %v1297_v50 }
 0x494   : > { %1395 = vmatpush.msrb.mxu2 %v1364_v22 }
 0x495   : > { %v1299_v52 = vmul.f32 %v1867_v49, %v1298_v51 }
 0x496   : > { %v1040_v30 = vpop.f32.mrf.mxu0 }
 0x497   : > { %1674 = vmatmul.msk.f32.vlgmr.msrb.gmra.mxu1 %vm896_vm1, %v1040_v30  ;;  %v1300_v53 = vadd.f32 %v1867_v49, %v1299_v52 }
 0x498   : > { %1355 = vmatpush.msrb.mxu1 %v1335_v59 }
 0x499   : > { %v2675_v54 = vsel %vm1301_vm4, %v1867_v49, %v1300_v53  ;;  %v1849_v49 = vld [vmem:[#allocation17] ss:$0 sm:$0xff] }
 0x49f   : > { %v1135_v33 = vpop.permute.xlu1 %1134 }
 0x4a0   : > { %1159 = vmatpush.msrb.mxu0 %v1135_v33 }
 0x4a1   : > { %1680 = vmatmul.msk.f32.vlgmr.msrb.gmra.mxu0 %vm928_vm3, %v1133_v32 }
 0x4a2   : > { %1281 = vmatpush.msra.mxu0 %v895_v34 }
 0x514   : > { %v1260_v36 = vpop.f32.mrf.mxu3  ;;  %v1063_v38 = vpop.f32.mrf.mxu1 }
 0x515   : > { %1687 = vmatmul.msk.f32.vlgmr.msra.gmra.mxu0 %vm896_vm1, %v1260_v36  ;;  %v1087_v39 = vadd.f32 %v2644_v60, %v1063_v38  ;;  %v1334_v60 = vld [vmem:[%s2773_s13 + $0x10] sm:$0xff] }
 0x516   : > { %1356 = vmatpush.msrb.mxu1 %v1334_v60 }
 0x518   : > { %1357 = vmatpush.msrb.mxu1 %v1333_v61 }
 0x51a   : > { %1358 = vmatpush.msrb.mxu1 %v1332_v62 }
 0x51e   : > { %v1161_v37 = vpop.f32.mrf.mxu0 }
 0x51f   : > { %1681 = vmatmul.msk.f32.vlgmr.msra.gmra.mxu1 %vm896_vm1, %v1161_v37 }
 0x592   : > { %v1283_v43 = vpop.f32.mrf.mxu0 }
 0x59c   : > { %v1184_v40 = vpop.f32.mrf.mxu1 }
 0x59d   : > { %v1187_v41 = vadd.f32 %v1184_v40, %v1087_v39 }
 0x59f   : > { %v1286_v44 = vadd.f32 %v1283_v43, %v1187_v41 }
 0x5a1   : > { %v1291_v45 = vadd.f32 %v1843_v42, %v1286_v44 }
 0x5a3   : > { %v1292_v46 = vadd.f32 %v1291_v45, %v2575_v9 }
 0x5a5   : > { %v1293_v47 = vsel %vm800_vm0, %v1292_v46, 0.0 }
 0x5a6   : > { %1294 = vadd.xlane.f32.xlu2 %v1293_v47 }
 0x619   : > { %v1295_v55 = vpop.xlane.xlu2 %1294 }
 0x61a   : > { %v1303_v56 = vmul.f32 %v2675_v54, %v1295_v55 }
 0x61c   : > { %v1304_v57 = vsub.f32 %v1292_v46, %v1303_v56  ;;  %v1848_v46 = vld [vmem:[%s2821_s29] ss:$0 sm:$0xff] }
 0x61e   : > { %v1305_v58 = vmul.f32 %v1304_v57, %v1304_v57 }
 0x620   : > { %v1306_v9 = vsel %vm800_vm0, %v1305_v58, 0.0 }
 0x621   : > { %1307 = vadd.xlane.f32.xlu0 %v1306_v9 }
 0x694   : > { %v1308_v2 = vpop.xlane.xlu0 %1307 }
 0x695   : > { %v1309_v3 = vmul.f32 %v1308_v2, %v2675_v54 }
 0x697   : > { %v1310_v5 = vadd.f32 1e-06, %v1309_v3 }
 0x699   : > { %1868 = vrsqrt.f32 %v1310_v5  ;;  %vm1317_vm6 = vweird.f32 %v1310_v5 }
 0x69f   : > { %v1869_v7 = vpop.eup %1868 }
 0x6a0   : > { %v1312_v8 = vmul.f32 %v1869_v7, %v1310_v5  ;;  %vm1318_vm5 = vweird.f32 %v1869_v7 }
 0x6a1   : > { %vm1319_vm7 = vmor %vm1317_vm6, %vm1318_vm5 }
 0x6a2   : > { %v1313_v10 = vmul.f32 %v1869_v7, %v1312_v8 }
 0x6a4   : > { %v1314_v11 = vmul.f32 0.5, %v1313_v10 }
 0x6a6   : > { %v1315_v12 = vsub.f32 1.5, %v1314_v11 }
 0x6a8   : > { %v1316_v13 = vmul.f32 %v1869_v7, %v1315_v12 }
 0x6aa   : > { %v1320_v15 = vsel %vm1319_vm7, %v1869_v7, %v1316_v13 }
 0x6ab   : > { %v1321_v16 = vmul.f32 %v1320_v15, %v1304_v57 }
 0x6ad   : > { %v1326_v18 = vmul.f32 %v1844_v14, %v1321_v16 }
 0x6af   : > { %v1331_v19 = vadd.f32 %v1845_v17, %v1326_v18 }
 0x6b1   : > { %1688 = vmatmul.msk.f32.vlgmr.msrb.gmra.mxu1 %vm800_vm0, %v1331_v19 }
 0x72e   : > { %v1360_v24 = vpop.f32.mrf.mxu1 }
 0x72f   : > { %v1361_v25 = vadd.f32 %v1846_v23, %v1360_v24 }
 0x731   : > { %v1363_v26 = vmax.f32 %v1361_v25, 0.0 }
 0x733   : > { %1689 = vmatmul.msk.f32.vlgmr.msrb.gmra.mxu2 %vm1376_vm8, %v1363_v26 }
 0x7b6   : > { %v1397_v28 = vpop.f32.mrf.mxu2 }
 0x7b7   : > { %v1398_v29 = vadd.f32 %v1847_v27, %v1397_v28 }
 0x7b9   : > { %v1400_v30 = vadd.f32 %v1398_v29, %v1331_v19 }
 0x7bb   : > { %v1401_v31 = vsel %vm800_vm0, %v1400_v30, 0.0 }
 0x7bc   : > { %1402 = vadd.xlane.f32.xlu1 %v1401_v31 }
 0x82f   : > { %v1403_v32 = vpop.xlane.xlu1 %1402 }
 0x830   : > { %v1404_v33 = vmul.f32 %v1403_v32, %v2675_v54 }
 0x832   : > { %v1405_v34 = vsub.f32 %v1400_v30, %v1404_v33 }
 0x834   : > { %v1406_v35 = vmul.f32 %v1405_v34, %v1405_v34 }
 0x836   : > { %v1407_v36 = vsel %vm800_vm0, %v1406_v35, 0.0 }
 0x837   : > { %1408 = vadd.xlane.f32.xlu2 %v1407_v36 }
 0x8aa   : > { %v1409_v37 = vpop.xlane.xlu2 %1408 }
 0x8ab   : > { %v1410_v38 = vmul.f32 %v1409_v37, %v2675_v54 }
 0x8ad   : > { %v1411_v39 = vadd.f32 1e-06, %v1410_v38 }
 0x8af   : > { %1870 = vrsqrt.f32 %v1411_v39  ;;  %vm1418_vm10 = vweird.f32 %v1411_v39 }
 0x8b5   : > { %v1871_v40 = vpop.eup %1870 }
 0x8b6   : > { %v1413_v41 = vmul.f32 %v1871_v40, %v1411_v39  ;;  %vm1419_vm9 = vweird.f32 %v1871_v40 }
 0x8b7   : > { %vm1420_vm11 = vmor %vm1418_vm10, %vm1419_vm9 }
 0x8b8   : > { %v1414_v42 = vmul.f32 %v1871_v40, %v1413_v41 }
 0x8ba   : > { %v1415_v43 = vmul.f32 0.5, %v1414_v42 }
 0x8bc   : > { %v1416_v44 = vsub.f32 1.5, %v1415_v43 }
 0x8be   : > { %v1417_v45 = vmul.f32 %v1871_v40, %v1416_v44 }
 0x8c0   : > { %v1421_v47 = vsel %vm1420_vm11, %v1871_v40, %v1417_v45 }
 0x8c1   : > { %v1422_v48 = vmul.f32 %v1421_v47, %v1405_v34 }
 0x8c3   : > { %v1427_v50 = vmul.f32 %v1848_v46, %v1422_v48 }
 0x8c5   : > { %v1432_v51 = vadd.f32 %v1849_v49, %v1427_v50 }
 0x8c7   : > { %1433 = vst.msk [vmem:[%s778_s16] sm:$0xff] %vm800_vm0, %v1432_v51 }
 0x8c8   : > { %2199 = shalt.err (!%p2196_p10)
}
 0x8c9   : > { %1737 = dma.vmem_to_hbm [thread:$0]  (%p2479_p13), %s1448_s18, 128, %s1450_s23, %s1435_s11  }
 0x8ca PF: > { %s1461_s2 = sand.u32 1, %s2246_s0   ;;  %p2824_p11 = scmp.ge.s32.totalorder %s2258_s21, 2 }
 0x8cb   : > { %s1462_s10 = scalar_lea.sflag [#allocation4], %s1461_s2 }
 0x8cc   : > { %p1772_p0 = pnand %p2824_p11, %p2484_p5 }
 0x8ce   : > { %p1773_p2 = pneg %p1772_p0 }
 0x8d0   : > { %2241 = dma.done.wait (%p1773_p2), %s1462_s10, 128  }
 0x8d1   : > { %2243 = vsyncadd (%p1773_p2), %s1462_s10, 4294967168  ;;  %p37_p6 = scmp.ge.s32.totalorder %s2459_s1, 4   ;;  %s2825_s0 = smov %s2250_s30 }
 0x8d2   : > { %s2826_s30 = smov %s2254_s20  ;;  %s2827_s20 = smov %s2471_s25 }
 0x8d3   : > { %s2828_s21 = smov %s2459_s1  ;;  %39 = sbr.rel (!%p37_p6) target bundleno = 27 (0x1b), region = 183 }
 0x8d8   :  { %1468 = vsyncpa [#allocation3], 1 }
 0x8d9   :  { %1470 = vsyncpa [#allocation3 + $0x1], 1 }
 0x8da   :  { %1471 = vsyncpa [#allocation6], 1 }
 0x8db   :  { %1472 = vsyncpa [#allocation9], 1 }
 0x8dc   :  { %1473 = vsyncpa [#allocation12], 1 }
 0x8dd   :  { %1474 = vsyncpa [#allocation15], 1 }
 0x8de   :  { %1475 = vsyncpa [#allocation18], 1 }
 0x8df   :  { %1476 = vsyncpa [#allocation4], 1 }
 0x8e0   :  { %1478 = vsyncpa [#allocation4 + $0x1], 1 }

</bundles_post_ra>
